<compile_context>
chip_gen: v7x
topology: tpu7x:2x2x1
jax: 0.10.0
libtpu: 0.0.40
codegen_flags: <defaults>
</compile_context>

<pallas_src>
import jax
import jax.numpy as jnp
from jax.experimental import pallas as pl
from jax.experimental.pallas import tpu as pltpu


_VMEM_BUDGET_BYTES = 24 * 1024 * 1024   # tile-plan budget (fits all generations)
_VMEM_LIMIT_BYTES = 32 * 1024 * 1024    # scoped limit we request (<= 64 MiB v7x physical)


def _round_up(x, m):
    return ((x + m - 1) // m) * m


def _choose_tiles(B, s1, s2):
    """Pick (TB, TK) so the double-buffered footprint stays under budget."""
    # Contraction tile: keep full s1 if small, otherwise 128-aligned chunks.
    TK = s1 if s1 <= 512 else 512

    def footprint(tb, tk):
        # 2x double-buffering for each pipelined input/output + accumulator.
        return 4 * (2 * tb * tk          # v1 tile
                    + 2 * tb * s2        # v2 tile
                    + 2 * tk * s2        # mat tile
                    + 2 * tb             # out tile
                    + tb)                # accumulator scratch

    # Shrink the weight tile first if the (TK, s2) slab alone is too fat
    # (only when TK is a 128-multiple, i.e. s1 > 512, so layout rules hold).
    while TK > 128 and TK % 128 == 0 and 2 * 4 * TK * s2 > _VMEM_BUDGET_BYTES // 2:
        TK //= 2

    # Batch tile: target 512 rows for pipelining efficiency, 8-row aligned.
    TB = min(512, _round_up(B, 8))
    while TB > 8 and footprint(TB, TK) > _VMEM_BUDGET_BYTES:
        TB //= 2
    TB = max(TB, 8)
    return TB, TK


def _bilinear_kernel(v1_ref, v2_ref, mat_ref, out_ref, acc_ref):
    k = pl.program_id(1)

    @pl.when(k == 0)
    def _():
        acc_ref[...] = jnp.zeros_like(acc_ref)

    # MXU matmul (TB, TK) @ (TK, s2) with f32 accumulation, then VPU multiply
    # and a lane reduction. (If a bundle dump ever shows the XLU as the binding
    # unit, the reduce can be routed through the MXU via `(bma*v2) @ ones`.)
    bma = jnp.dot(v1_ref[...], mat_ref[...], preferred_element_type=jnp.float32)
    acc_ref[...] += jnp.sum(bma * v2_ref[...], axis=-1, keepdims=True)

    @pl.when(k == pl.num_programs(1) - 1)
    def _():
        # NOTE: (TB, 1) output is a masked lane store; negligible here (4*B bytes).
        out_ref[...] = acc_ref[...].astype(out_ref.dtype)


def bilinear(vector1, vector2, mat):
    """Pallas implementation of Bilinear.forward. Returns shape (B, 1) f32."""
    B, s1 = vector1.shape
    B2, s2 = vector2.shape
    assert B == B2, (B, B2)
    assert mat.shape == (s1, s2), (mat.shape, s1, s2)

    TB, TK = _choose_tiles(B, s1, s2)
    Bp = _round_up(B, TB)
    Kp = _round_up(s1, TK)

    v1 = vector1.astype(jnp.float32)
    v2 = vector2.astype(jnp.float32)
    m = mat.astype(jnp.float32)
    if Bp != B:
        v1 = jnp.pad(v1, ((0, Bp - B), (0, 0)))
        v2 = jnp.pad(v2, ((0, Bp - B), (0, 0)))
    if Kp != s1:
        v1 = jnp.pad(v1, ((0, 0), (0, Kp - s1)))
        m = jnp.pad(m, ((0, Kp - s1), (0, 0)))

    grid = (Bp // TB, Kp // TK)

    out = pl.pallas_call(
        _bilinear_kernel,
        out_shape=jax.ShapeDtypeStruct((Bp, 1), jnp.float32),
        grid_spec=pltpu.PrefetchScalarGridSpec(
            num_scalar_prefetch=0,
            grid=grid,
            in_specs=[
                pl.BlockSpec((TB, TK), lambda b, k: (b, k)),   # vector1
                pl.BlockSpec((TB, s2), lambda b, k: (b, 0)),   # vector2
                pl.BlockSpec((TK, s2), lambda b, k: (k, 0)),   # mat
            ],
            out_specs=pl.BlockSpec((TB, 1), lambda b, k: (b, 0)),
            scratch_shapes=[pltpu.VMEM((TB, 1), jnp.float32)],
        ),
        compiler_params=pltpu.CompilerParams(
            # B axis parallel (megacore on v7x); K axis is the reduction.
            dimension_semantics=("parallel", "arbitrary"),
            vmem_limit_bytes=_VMEM_LIMIT_BYTES,
        ),
    )(v1, v2, m)

    if Bp != B:
        out = out[:B]
    return out


def bilinear_ref(vector1, vector2, mat):
    # Pure-JAX reference mirroring the PyTorch forward exactly.
    bma = (vector1 @ mat)[:, None, :]                         # (B, 1, S2)
    ba = jnp.matmul(bma, vector2[:, :, None]).reshape(-1, 1)  # (B, 1)
    return ba


if __name__ == "__main__":
    key = jax.random.PRNGKey(0)
    k1, k2, k3, k4, k5, k6 = jax.random.split(key, 6)

    # --- primary small case (matches module defaults) ---
    B, size_1, size_2 = 8, 32, 32
    # Deterministic "normal_()" init of the parameter, as in reset_parameters().
    mat = jax.random.normal(k3, (size_1, size_2), dtype=jnp.float32)
    vector1 = jax.random.normal(k1, (B, size_1), dtype=jnp.float32)
    vector2 = jax.random.normal(k2, (B, size_2), dtype=jnp.float32)

    out = jax.block_until_ready(bilinear(vector1, vector2, mat))
    ref = bilinear_ref(vector1, vector2, mat)
    assert out.shape == (B, 1), out.shape
    assert jnp.allclose(out, ref, atol=1e-4, rtol=1e-4), (out, ref)

    # --- small ragged case to exercise batch/K padding path ---
    B2, s1b, s2b = 37, 96, 48
    mat_b = jax.random.normal(k6, (s1b, s2b), dtype=jnp.float32)
    v1_b = jax.random.normal(k4, (B2, s1b), dtype=jnp.float32)
    v2_b = jax.random.normal(k5, (B2, s2b), dtype=jnp.float32)

    out_b = jax.block_until_ready(bilinear(v1_b, v2_b, mat_b))
    ref_b = bilinear_ref(v1_b, v2_b, mat_b)
    assert out_b.shape == (B2, 1), out_b.shape
    assert jnp.allclose(out_b, ref_b, atol=1e-3, rtol=1e-3), (out_b, ref_b)

    print("KERNEL_OK")
</pallas_src>

<mosaic_0001>
module attributes {stable_mosaic.version = 11 : i64} {
  func.func @_bilinear_kernel(%arg0: i32, %arg1: i32, %arg2: memref<8x32xf32, #tpu.memory_space<vmem>>, %arg3: memref<8x32xf32, #tpu.memory_space<vmem>>, %arg4: memref<32x32xf32, #tpu.memory_space<vmem>>, %arg5: memref<8x1xf32, #tpu.memory_space<vmem>>, %arg6: memref<8x1xf32, #tpu.memory_space<vmem>>) attributes {dimension_semantics = [#tpu.dimension_semantics<parallel>, #tpu.dimension_semantics<arbitrary>], iteration_bounds = array<i64: 1, 1>, scalar_prefetch = 0 : i64, scratch_operands = 1 : i64, tpu.core_type = #tpu.core_type<tc>, window_params = [{transform_indices = @transform_0, window_bounds = array<i64: 8, 32>}, {transform_indices = @transform_1, window_bounds = array<i64: 8, 32>}, {transform_indices = @transform_2, window_bounds = array<i64: 32, 32>}, {transform_indices = @transform_3, window_bounds = array<i64: 8, 1>}]} {
    %c0_i32 = arith.constant 0 : i32
    %0 = arith.cmpi eq, %arg1, %c0_i32 : i32
    %1 = arith.extui %0 : i1 to i32
    %c0_i32_0 = arith.constant 0 : i32
    %2 = arith.cmpi ne, %1, %c0_i32_0 : i32
    scf.if %2 {
      %cst_13 = arith.constant 0.000000e+00 : f32
      %16 = vector.broadcast %cst_13 : f32 to vector<8x1xf32>
      %c0_14 = arith.constant 0 : index
      %c0_15 = arith.constant 0 : index
      %17 = vector.load %arg6[%c0_14, %c0_15] : memref<8x1xf32, #tpu.memory_space<vmem>>, vector<8x1xf32>
      tpu.vector_store %arg6[%c0_14, %c0_15], %16 {strides = array<i32>} : memref<8x1xf32, #tpu.memory_space<vmem>>, vector<8x1xf32>,
    } else {
    }
    %c0 = arith.constant 0 : index
    %c0_1 = arith.constant 0 : index
    %3 = vector.load %arg2[%c0, %c0_1] : memref<8x32xf32, #tpu.memory_space<vmem>>, vector<8x32xf32>
    %c0_2 = arith.constant 0 : index
    %c0_3 = arith.constant 0 : index
    %4 = vector.load %arg4[%c0_2, %c0_3] : memref<32x32xf32, #tpu.memory_space<vmem>>, vector<32x32xf32>
    %cst = arith.constant dense<0.000000e+00> : vector<8x32xf32>
    %5 = tpu.matmul %3, %4, %cst {dimension_numbers = #tpu.dot_dimension_numbers<[1], [0], [0], [1], [0, 0, 1, 1], [], []>} : vector<8x32xf32>, vector<32x32xf32>, vector<8x32xf32> -> vector<8x32xf32>
    %c0_4 = arith.constant 0 : index
    %c0_5 = arith.constant 0 : index
    %6 = vector.load %arg6[%c0_4, %c0_5] : memref<8x1xf32, #tpu.memory_space<vmem>>, vector<8x1xf32>
    %c0_6 = arith.constant 0 : index
    %c0_7 = arith.constant 0 : index
    %7 = vector.load %arg3[%c0_6, %c0_7] : memref<8x32xf32, #tpu.memory_space<vmem>>, vector<8x32xf32>
    %8 = arith.mulf %5, %7 : vector<8x32xf32>
    %cst_8 = arith.constant dense<0.000000e+00> : vector<8xf32>
    %9 = vector.multi_reduction <add>, %8, %cst_8 [1] : vector<8x32xf32> to vector<8xf32>
    %10 = vector.shape_cast %9 : vector<8xf32> to vector<8x1xf32>
    %11 = arith.addf %6, %10 : vector<8x1xf32>
    %c0_9 = arith.constant 0 : index
    %c0_10 = arith.constant 0 : index
    %12 = vector.load %arg6[%c0_9, %c0_10] : memref<8x1xf32, #tpu.memory_space<vmem>>, vector<8x1xf32>
    tpu.vector_store %arg6[%c0_9, %c0_10], %11 {strides = array<i32>} : memref<8x1xf32, #tpu.memory_space<vmem>>, vector<8x1xf32>,
    %c0_i32_11 = arith.constant 0 : i32
    %13 = arith.cmpi eq, %arg1, %c0_i32_11 : i32
    %14 = arith.extui %13 : i1 to i32
    %c0_i32_12 = arith.constant 0 : i32
    %15 = arith.cmpi ne, %14, %c0_i32_12 : i32
    scf.if %15 {
      %c0_13 = arith.constant 0 : index
      %c0_14 = arith.constant 0 : index
      %16 = vector.load %arg6[%c0_13, %c0_14] : memref<8x1xf32, #tpu.memory_space<vmem>>, vector<8x1xf32>
      %c0_15 = arith.constant 0 : index
      %c0_16 = arith.constant 0 : index
      %17 = vector.load %arg5[%c0_15, %c0_16] : memref<8x1xf32, #tpu.memory_space<vmem>>, vector<8x1xf32>
      tpu.vector_store %arg5[%c0_15, %c0_16], %16 {strides = array<i32>} : memref<8x1xf32, #tpu.memory_space<vmem>>, vector<8x1xf32>,
    } else {
    }
    return
  }
  func.func @transform_0(%arg0: i32, %arg1: i32) -> (i32, i32) {
    %c0_i32 = arith.constant 0 : i32
    return %arg0, %arg1 : i32, i32
  }
  func.func @transform_1(%arg0: i32, %arg1: i32) -> (i32, i32) {
    %c0_i32 = arith.constant 0 : i32
    %c0_i32_0 = arith.constant 0 : i32
    return %arg0, %c0_i32 : i32, i32
  }
  func.func @transform_2(%arg0: i32, %arg1: i32) -> (i32, i32) {
    %c0_i32 = arith.constant 0 : i32
    %c0_i32_0 = arith.constant 0 : i32
    return %arg1, %c0_i32 : i32, i32
  }
  func.func @transform_3(%arg0: i32, %arg1: i32) -> (i32, i32) {
    %c0_i32 = arith.constant 0 : i32
    %c0_i32_0 = arith.constant 0 : i32
    return %arg0, %c0_i32 : i32, i32
  }
}

</mosaic_0001>

<bundles_post_ra>
// kernel: tpu_custom_call.1
= control target key start
LH: loop header
LB: loop body
LE: loop exit
PB: predicated region body
PF: predicated region fallthrough
CT: control target
= control target key end

     0   :  { %8 = vsyncpa [#allocation4], 0  ;;  %s327_s0 = inlined_call_operand.hbm [shape: f32[8,32], index: 0, kind: input, shape index: {}]   ;;  %s328_s1 = inlined_call_operand.hbm [shape: f32[8,32], index: 1, kind: input, shape index: {}]   ;;  %s329_s2 = inlined_call_operand.hbm [shape: f32[32,32], index: 2, kind: input, shape index: {}]   ;;  %s330_s3 = inlined_call_operand.vmem [shape: f32[8,1], index: 3, kind: output, shape index: {}]  }
   0x1   :  { %9 = vsyncpa [#allocation6], 0  ;;  %s257_s12 = smov [#allocation5]   ;;  %s258_s14 = smov [#allocation3]  }
   0x2   :  { %s26_s13 = sshll.u32 %s257_s12, 4  ;;  %s16_s15 = sshll.u32 %s258_s14, 4  ;;  %s27_s13 = int_to_ptr.vmem [resolvable:$true] %s26_s13  ;;  %s17_s15 = int_to_ptr.vmem [resolvable:$true] %s16_s15 }
   0x3   :  { %s187_s18 = scalar_lea.hbm %s328_s1, 128 }
   0x4   :  { %p188_p0 = scmp.ne.s32.totalorder %s328_s1, %s187_s18  ;;  %p191_p1 = scmp.lt.u32.totalorder %s187_s18, %s328_s1 }
   0x6   :  { %p193_p2 = pnand %p191_p1, %p188_p0 }
   0x8   :  { %196 = shalt.err (!%p193_p2)
}
   0x9   :  { %s197_s23 = scalar_lea.vmem %s27_s13, 128  ;;  %p202_p4 = scmp.lt.s32.totalorder %s27_s13, %s27_s13 }
   0xa   :  { %p198_p3 = scmp.ne.s32.totalorder %s27_s13, %s197_s23  ;;  %p203_p5 = scmp.lt.s32.totalorder %s197_s23, %s197_s23 }
   0xc   :  { %p204_p6 = por %p203_p5, %p202_p4 }
   0xe   :  { %p205_p7 = pnand %p204_p6, %p198_p3 }
  0x10   :  { %208 = shalt.err (!%p205_p7)
}
  0x11   :  { %29 = dma.hbm_to_vmem [thread:$0]  %s328_s1, 128, %s27_s13, [#allocation6]  }
  0x12   :  { %s209_s28 = scalar_lea.hbm %s327_s0, 128 }
  0x13   :  { %p210_p8 = scmp.ne.s32.totalorder %s327_s0, %s209_s28  ;;  %p213_p9 = scmp.lt.u32.totalorder %s209_s28, %s327_s0 }
  0x15   :  { %p215_p10 = pnand %p213_p9, %p210_p8 }
  0x17   :  { %218 = shalt.err (!%p215_p10)
}
  0x18   :  { %s219_s6 = scalar_lea.vmem %s17_s15, 128  ;;  %p224_p12 = scmp.lt.s32.totalorder %s17_s15, %s17_s15 }
  0x19   :  { %p220_p11 = scmp.ne.s32.totalorder %s17_s15, %s219_s6  ;;  %p225_p13 = scmp.lt.s32.totalorder %s219_s6, %s219_s6 }
  0x1b   :  { %p226_p0 = por %p225_p13, %p224_p12 }
  0x1d   :  { %p227_p1 = pnand %p226_p0, %p220_p11 }
  0x1f   :  { %230 = shalt.err (!%p227_p1)
}
  0x20   :  { %19 = dma.hbm_to_vmem [thread:$0]  %s327_s0, 128, %s17_s15, [#allocation4]  }
  0x21   :  { %s259_s8 = smov [#allocation7]   ;;  %s231_s12 = scalar_lea.hbm %s329_s2, 512 }
  0x22   :  { %s35_s9 = sshll.u32 %s259_s8, 4  ;;  %p232_p2 = scmp.ne.s32.totalorder %s329_s2, %s231_s12  ;;  %s36_s9 = int_to_ptr.vmem [resolvable:$true] %s35_s9 }
  0x23   :  { %p235_p3 = scmp.lt.u32.totalorder %s231_s12, %s329_s2 }
  0x25   :  { %p237_p4 = pnand %p235_p3, %p232_p2 }
  0x27   :  { %240 = shalt.err (!%p237_p4)
}
  0x28   :  { %s241_s18 = scalar_lea.vmem %s36_s9, 512  ;;  %p246_p6 = scmp.lt.s32.totalorder %s36_s9, %s36_s9 }
  0x29   :  { %p242_p5 = scmp.ne.s32.totalorder %s36_s9, %s241_s18  ;;  %p247_p7 = scmp.lt.s32.totalorder %s241_s18, %s241_s18 }
  0x2b   :  { %p248_p8 = por %p247_p7, %p246_p6 }
  0x2d   :  { %p249_p9 = pnand %p248_p8, %p242_p5 }
  0x2f   :  { %252 = shalt.err (!%p249_p9)
}
  0x30   :  { %s260_s0 = smov 128   ;;  %s261_s15 = smov 8  }
  0x31   :  { %41 = dma.hbm_to_vmem [thread:$0]  %s329_s2, 512, %s36_s9, [#allocation6], %s260_s0, %s260_s0, %s261_s15  }
  0x32   :  { %253 = dma.done.wait [#allocation4], 128  }
  0x33   :  { %254 = vsyncadd [#allocation4], 4294967168 }
  0x34   :  { %255 = dma.done.wait [#allocation6], 640  }
  0x35   :  { %256 = vsyncadd [#allocation6], 4294966656  ;;  %vm55_vm0 = vcmask 7168   ;;  %v262_v0 = vmov 0.0|0.0   ;;  %v263_v1 = vmov 0.0   ;;  %vm264_vm1 = vmmov 0  }
  0x36   :  { %173 = vmatprep.subr.bf16.mxu0 %v262_v0  ;;  %56 = vst.msk [vmem:[#allocation2] sm:$0xff] %vm55_vm0, %v263_v1  ;;  %170 = vmatprep.mubr.msk.f32.mxu0 %vm264_vm1, %v263_v1  ;;  %v58_v2 = vld [vmem:[#allocation7] sm:$0xff]  ;;  %v59_v3 = vld [vmem:[#allocation7 + $0x8] sm:$0xff]  ;;  %v60_v4 = vld [vmem:[#allocation7 + $0x10] sm:$0xff]  ;;  %vm62_vm2 = vcmask 261120  }
  0x37   :  { %v174_v5 = vpack.c.bf16 %v59_v3, %v58_v2  ;;  %v61_v6 = vld [vmem:[#allocation7 + $0x18] sm:$0xff]  ;;  %v57_v8 = vld [vmem:[#allocation3] sm:$0xff] }
  0x38   :  { %v177_v7 = vpack.c.bf16 %v61_v6, %v60_v4  ;;  %v137_v9 = vld [vmem:[#allocation5] sm:$0xff] }
  0x39   :  { %175 = vmatpush3.bf16.msra.mxu0 %v174_v5 }
  0x3a   :  { %176 = vmatprep.subr.bf16.mxu0 %v262_v0 }
  0x3d   :  { %178 = vmatpush3.bf16.msra.mxu0 %v177_v7  ;;  %v136_v14 = vld [vmem:[#allocation2] sm:$0xff] }
  0x40   :  { %171 = vmatmul.mubr.msk.f32.vlgmr.msra.gmra.mrb[0].mxu0 %vm62_vm2, %v57_v8 }
 0x113   :  { %v132_v10 = vpop.f32.mrb[0].mxu0 }
 0x114   :  { %v138_v11 = vmul.f32 %v137_v9, %v132_v10  ;;  %v172_v12 = vpop.f32.mrb[1].mxu0 }
 0x116   :  { %v139_v13 = vsel %vm62_vm2, %v138_v11, 0.0 }
 0x117   :  { %140 = vadd.xlane.f32.xlu0 %v139_v13 }
 0x1a4   :  { %v141_v15 = vpop.xlane.xlu0 %140 }
 0x1a5   :  { %v142_v16 = vadd.f32 %v141_v15, %v136_v14 }
 0x1a7   :  { %144 = vst.msk [vmem:[#allocation2] sm:$0xff] %vm55_vm0, %v142_v16 }
 0x1ae   :  { %v148_v17 = vld [vmem:[#allocation2] sm:$0xff] }
 0x1af   :  { %149 = vst.msk [vmem:[%s330_s3] sm:$0xff] %vm55_vm0, %v148_v17 }
 0x1b0   :  { %154 = vsyncpa [#allocation4], 1 }
 0x1b1   :  { %155 = vsyncpa [#allocation6], 1 }

</bundles_post_ra>
